<compile_context>
chip_gen: v7x
topology: tpu7x:2x2x1
jax: 0.10.0
libtpu: 0.0.40
codegen_flags: <defaults>
</compile_context>

<pallas_src>
import jax
import jax.numpy as jnp
from jax import lax
from jax.experimental import pallas as pl
from jax.experimental.pallas import tpu as pltpu

_NEG_INF = -1e30  # padding-lane logit bias; exp() underflows to exactly 0 in f32


def _round_up(x, m):
    return (x + m - 1) // m * m


def _mlp_kernel(x_ref, w1_ref, w2_ref, w3_ref, b_ref, o_ref):
    # Contract the last axis of both operands: x (bb, K) @ w (N, K) -> (bb, N).
    dn = (((1,), (1,)), ((), ()))

    x = x_ref[...].astype(jnp.bfloat16)

    # fc1 + ReLU  (dropout is identity in eval mode)
    h1 = lax.dot_general(x, w1_ref[...], dn, preferred_element_type=jnp.float32)
    h1 = jnp.maximum(h1 + b_ref[0:1, :], 0.0)

    # fc2 + ReLU
    h2 = lax.dot_general(h1.astype(jnp.bfloat16), w2_ref[...], dn,
                         preferred_element_type=jnp.float32)
    h2 = jnp.maximum(h2 + b_ref[1:2, :], 0.0)

    # fc3  (padding output lanes get bias -1e30 -> excluded from softmax)
    logits = lax.dot_general(h2.astype(jnp.bfloat16), w3_ref[...], dn,
                             preferred_element_type=jnp.float32)
    logits = logits + b_ref[2:3, :]

    # numerically stable log_softmax along the lane axis (f32 on VPU/EUP)
    m = jnp.max(logits, axis=-1, keepdims=True)
    shifted = logits - m
    lse = jnp.log(jnp.sum(jnp.exp(shifted), axis=-1, keepdims=True))
    o_ref[...] = (shifted - lse).astype(o_ref.dtype)


def prepare_params(params):
    """One-time prep of PyTorch-layout params for the kernel.

    Keeps nn.Linear's (out, in) weight layout (no transpose), casts weights to
    bf16, zero-pads every layer width to a common multiple of 128, and packs
    the three biases into a single (3, npad) f32 buffer (fc3 padding lanes
    hold -1e30 so they never contribute to log_softmax).
    """
    w1, b1 = params["w1"], params["b1"]   # (h1, n_in), (h1,)
    w2, b2 = params["w2"], params["b2"]   # (h2, h1),   (h2,)
    w3, b3 = params["w3"], params["b3"]   # (n_out, h2),(n_out,)
    n_in = w1.shape[1]
    h1, h2, n_out = w1.shape[0], w2.shape[0], w3.shape[0]
    npad = _round_up(max(h1, h2, n_out), 128)

    def pad_w(w, rows, cols):
        buf = jnp.zeros((rows, cols), jnp.bfloat16)
        return buf.at[: w.shape[0], : w.shape[1]].set(w.astype(jnp.bfloat16))

    w1p = pad_w(w1, npad, n_in)     # (npad, n_in)
    w2p = pad_w(w2, npad, npad)     # (npad, npad)
    w3p = pad_w(w3, npad, npad)     # (npad, npad)

    bias = jnp.zeros((3, npad), jnp.float32)
    bias = bias.at[0, :h1].set(b1.astype(jnp.float32))
    bias = bias.at[1, :h2].set(b2.astype(jnp.float32))
    bias = bias.at[2, :].set(_NEG_INF)
    bias = bias.at[2, :n_out].set(b3.astype(jnp.float32))

    return {"w1": w1p, "w2": w2p, "w3": w3p, "bias": bias,
            "n_in": n_in, "n_out": n_out, "npad": npad}


def classifier_forward(x, prep):
    """x: [B, C, H, W] float32 (NCHW). prep: output of prepare_params()."""
    B = x.shape[0]
    x_flat = x.reshape(B, -1)                # same as x.view(x.shape[0], -1)
    n_in, n_out, npad = prep["n_in"], prep["n_out"], prep["npad"]
    assert x_flat.shape[1] == n_in
    w1, w2, w3, bias = prep["w1"], prep["w2"], prep["w3"], prep["bias"]

    # Batch tiling: largest power-of-two block <= 512 that divides B;
    # otherwise take the (small) batch as one full-dim block.
    bb = B
    for cand in (512, 256, 128, 64, 32, 16, 8):
        if B % cand == 0:
            bb = cand
            break
    grid = (B // bb,)

    flops = 2 * B * (n_in * npad + npad * npad + npad * npad)
    bytes_accessed = (x_flat.size * x_flat.dtype.itemsize
                      + (w1.size + w2.size + w3.size) * 2   # bf16 weights
                      + bias.size * 4
                      + B * npad * 4)                       # f32 output slab
    cost = pl.CostEstimate(flops=flops,
                           transcendentals=2 * B * npad,    # exp + log
                           bytes_accessed=bytes_accessed)

    def resident(shape):
        # Same block for every batch step -> stays loaded in VMEM.
        return pl.BlockSpec(shape, lambda i: (0, 0))

    out_padded = pl.pallas_call(
        _mlp_kernel,
        out_shape=jax.ShapeDtypeStruct((B, npad), jnp.float32),
        grid=grid,
        in_specs=[
            pl.BlockSpec((bb, n_in), lambda i: (i, 0)),   # activations, tiled over batch
            resident(w1.shape),
            resident(w2.shape),
            resident(w3.shape),
            resident(bias.shape),
        ],
        out_specs=pl.BlockSpec((bb, npad), lambda i: (i, 0)),
        compiler_params=pltpu.CompilerParams(
            dimension_semantics=("parallel",)),
        cost_estimate=cost,
    )(x_flat, w1, w2, w3, bias)

    # Lane-dense 128-wide slab -> slice back to the real class count.
    return out_padded[:, :n_out]


def init_params(key, n_input, n_hidden1, n_hidden2, n_output):
    """Deterministic synthetic init mirroring nn.Linear parameter shapes."""
    ks = jax.random.split(key, 6)

    def lin(kw, kb, fan_in, fan_out):
        bound = 1.0 / jnp.sqrt(fan_in)
        w = jax.random.uniform(kw, (fan_out, fan_in), jnp.float32, -bound, bound)
        b = jax.random.uniform(kb, (fan_out,), jnp.float32, -bound, bound)
        return w, b

    w1, b1 = lin(ks[0], ks[1], n_input, n_hidden1)
    w2, b2 = lin(ks[2], ks[3], n_hidden1, n_hidden2)
    w3, b3 = lin(ks[4], ks[5], n_hidden2, n_output)
    return {"w1": w1, "b1": b1, "w2": w2, "b2": b2, "w3": w3, "b3": b3}


if __name__ == "__main__":
    key = jax.random.PRNGKey(0)
    kx, kp = jax.random.split(key)

    # Small shapes implied by the forward: flatten an image batch.
    B, C, H, W = 2, 4, 16, 16
    n_input = C * H * W              # 1024
    n_hidden1, n_hidden2, n_output = 128, 64, 10

    x = jax.random.normal(kx, (B, C, H, W), jnp.float32)
    params = init_params(kp, n_input, n_hidden1, n_hidden2, n_output)
    prep = prepare_params(params)    # one-time: bf16 cast + lane-dense padding

    out = classifier_forward(x, prep)
    out = jax.block_until_ready(out)

    assert out.shape == (B, n_output)
    # log_softmax rows exponentiate-and-sum to 1
    assert jnp.allclose(jnp.sum(jnp.exp(out), axis=1), 1.0, atol=1e-4)

    # cross-check against a pure-JAX f32 reference (bf16 weights -> loose tol)
    def ref(x, p):
        xf = x.reshape(x.shape[0], -1)
        h = jnp.maximum(xf @ p["w1"].T + p["b1"], 0.0)
        h = jnp.maximum(h @ p["w2"].T + p["b2"], 0.0)
        lg = h @ p["w3"].T + p["b3"]
        return jax.nn.log_softmax(lg, axis=1)

    assert jnp.allclose(out, ref(x, params), atol=5e-2)

    print("KERNEL_OK")
</pallas_src>

<mosaic_0001>
module attributes {stable_mosaic.version = 11 : i64} {
  func.func @_mlp_kernel(%arg0: i32, %arg1: memref<2x1024xf32, #tpu.memory_space<vmem>>, %arg2: memref<128x1024xbf16, #tpu.memory_space<vmem>>, %arg3: memref<128x128xbf16, #tpu.memory_space<vmem>>, %arg4: memref<128x128xbf16, #tpu.memory_space<vmem>>, %arg5: memref<3x128xf32, #tpu.memory_space<vmem>>, %arg6: memref<2x128xf32, #tpu.memory_space<vmem>>) attributes {dimension_semantics = [#tpu.dimension_semantics<parallel>], iteration_bounds = array<i64: 1>, scalar_prefetch = 0 : i64, scratch_operands = 0 : i64, tpu.core_type = #tpu.core_type<tc>, window_params = [{transform_indices = @transform_0, window_bounds = array<i64: 2, 1024>}, {pipeline_mode = #tpu.pipeline_mode<synchronous>, transform_indices = @transform_1, window_bounds = array<i64: 128, 1024>}, {pipeline_mode = #tpu.pipeline_mode<synchronous>, transform_indices = @transform_2, window_bounds = array<i64: 128, 128>}, {pipeline_mode = #tpu.pipeline_mode<synchronous>, transform_indices = @transform_3, window_bounds = array<i64: 128, 128>}, {pipeline_mode = #tpu.pipeline_mode<synchronous>, transform_indices = @transform_4, window_bounds = array<i64: 3, 128>}, {transform_indices = @transform_5, window_bounds = array<i64: 2, 128>}]} {
    %c0 = arith.constant 0 : index
    %c0_0 = arith.constant 0 : index
    %0 = vector.load %arg1[%c0, %c0_0] : memref<2x1024xf32, #tpu.memory_space<vmem>>, vector<2x1024xf32>
    %1 = arith.truncf %0 : vector<2x1024xf32> to vector<2x1024xbf16>
    %c0_1 = arith.constant 0 : index
    %c0_2 = arith.constant 0 : index
    %2 = vector.load %arg2[%c0_1, %c0_2] : memref<128x1024xbf16, #tpu.memory_space<vmem>>, vector<128x1024xbf16>
    %cst = arith.constant dense<0.000000e+00> : vector<2x128xf32>
    %3 = tpu.matmul %1, %2, %cst {dimension_numbers = #tpu.dot_dimension_numbers<[1], [1], [0], [0], [0, 0, 1, 0], [], []>} : vector<2x1024xbf16>, vector<128x1024xbf16>, vector<2x128xf32> -> vector<2x128xf32>
    %c0_3 = arith.constant 0 : index
    %c0_4 = arith.constant 0 : index
    %4 = vector.load %arg5[%c0_3, %c0_4] : memref<3x128xf32, #tpu.memory_space<vmem>>, vector<1x128xf32>
    %5 = vector.broadcast %4 : vector<1x128xf32> to vector<2x128xf32>
    %6 = arith.addf %3, %5 : vector<2x128xf32>
    %cst_5 = arith.constant 0.000000e+00 : f32
    %7 = vector.broadcast %cst_5 : f32 to vector<2x128xf32>
    %8 = arith.maximumf %6, %7 : vector<2x128xf32>
    %9 = arith.truncf %8 : vector<2x128xf32> to vector<2x128xbf16>
    %c0_6 = arith.constant 0 : index
    %c0_7 = arith.constant 0 : index
    %10 = vector.load %arg3[%c0_6, %c0_7] : memref<128x128xbf16, #tpu.memory_space<vmem>>, vector<128x128xbf16>
    %cst_8 = arith.constant dense<0.000000e+00> : vector<2x128xf32>
    %11 = tpu.matmul %9, %10, %cst_8 {dimension_numbers = #tpu.dot_dimension_numbers<[1], [1], [0], [0], [0, 0, 1, 0], [], []>} : vector<2x128xbf16>, vector<128x128xbf16>, vector<2x128xf32> -> vector<2x128xf32>
    %c1 = arith.constant 1 : index
    %c0_9 = arith.constant 0 : index
    %12 = vector.load %arg5[%c1, %c0_9] : memref<3x128xf32, #tpu.memory_space<vmem>>, vector<1x128xf32>
    %13 = vector.broadcast %12 : vector<1x128xf32> to vector<2x128xf32>
    %14 = arith.addf %11, %13 : vector<2x128xf32>
    %cst_10 = arith.constant 0.000000e+00 : f32
    %15 = vector.broadcast %cst_10 : f32 to vector<2x128xf32>
    %16 = arith.maximumf %14, %15 : vector<2x128xf32>
    %17 = arith.truncf %16 : vector<2x128xf32> to vector<2x128xbf16>
    %c0_11 = arith.constant 0 : index
    %c0_12 = arith.constant 0 : index
    %18 = vector.load %arg4[%c0_11, %c0_12] : memref<128x128xbf16, #tpu.memory_space<vmem>>, vector<128x128xbf16>
    %cst_13 = arith.constant dense<0.000000e+00> : vector<2x128xf32>
    %19 = tpu.matmul %17, %18, %cst_13 {dimension_numbers = #tpu.dot_dimension_numbers<[1], [1], [0], [0], [0, 0, 1, 0], [], []>} : vector<2x128xbf16>, vector<128x128xbf16>, vector<2x128xf32> -> vector<2x128xf32>
    %c2 = arith.constant 2 : index
    %c0_14 = arith.constant 0 : index
    %20 = vector.load %arg5[%c2, %c0_14] : memref<3x128xf32, #tpu.memory_space<vmem>>, vector<1x128xf32>
    %21 = vector.broadcast %20 : vector<1x128xf32> to vector<2x128xf32>
    %22 = arith.addf %19, %21 : vector<2x128xf32>
    %cst_15 = arith.constant dense<0xFF800000> : vector<2xf32>
    %23 = vector.multi_reduction <maximumf>, %22, %cst_15 [1] : vector<2x128xf32> to vector<2xf32>
    %24 = vector.shape_cast %23 : vector<2xf32> to vector<2x1xf32>
    %25 = vector.broadcast %24 : vector<2x1xf32> to vector<2x128xf32>
    %26 = arith.subf %22, %25 : vector<2x128xf32>
    %27 = math.exp %26 : vector<2x128xf32>
    %cst_16 = arith.constant dense<0.000000e+00> : vector<2xf32>
    %28 = vector.multi_reduction <add>, %27, %cst_16 [1] : vector<2x128xf32> to vector<2xf32>
    %29 = vector.shape_cast %28 : vector<2xf32> to vector<2x1xf32>
    %30 = math.log %29 : vector<2x1xf32>
    %31 = vector.broadcast %30 : vector<2x1xf32> to vector<2x128xf32>
    %32 = arith.subf %26, %31 : vector<2x128xf32>
    %c0_17 = arith.constant 0 : index
    %c0_18 = arith.constant 0 : index
    %33 = vector.load %arg6[%c0_17, %c0_18] : memref<2x128xf32, #tpu.memory_space<vmem>>, vector<2x128xf32>
    tpu.vector_store %arg6[%c0_17, %c0_18], %32 {strides = array<i32>} : memref<2x128xf32, #tpu.memory_space<vmem>>, vector<2x128xf32>,
    return
  }
  func.func @transform_0(%arg0: i32) -> (i32, i32) {
    %c0_i32 = arith.constant 0 : i32
    %c0_i32_0 = arith.constant 0 : i32
    return %arg0, %c0_i32 : i32, i32
  }
  func.func @transform_1(%arg0: i32) -> (i32, i32) {
    %c0_i32 = arith.constant 0 : i32
    %c0_i32_0 = arith.constant 0 : i32
    %c0_i32_1 = arith.constant 0 : i32
    return %c0_i32, %c0_i32_0 : i32, i32
  }
  func.func @transform_2(%arg0: i32) -> (i32, i32) {
    %c0_i32 = arith.constant 0 : i32
    %c0_i32_0 = arith.constant 0 : i32
    %c0_i32_1 = arith.constant 0 : i32
    return %c0_i32, %c0_i32_0 : i32, i32
  }
  func.func @transform_3(%arg0: i32) -> (i32, i32) {
    %c0_i32 = arith.constant 0 : i32
    %c0_i32_0 = arith.constant 0 : i32
    %c0_i32_1 = arith.constant 0 : i32
    return %c0_i32, %c0_i32_0 : i32, i32
  }
  func.func @transform_4(%arg0: i32) -> (i32, i32) {
    %c0_i32 = arith.constant 0 : i32
    %c0_i32_0 = arith.constant 0 : i32
    %c0_i32_1 = arith.constant 0 : i32
    return %c0_i32, %c0_i32_0 : i32, i32
  }
  func.func @transform_5(%arg0: i32) -> (i32, i32) {
    %c0_i32 = arith.constant 0 : i32
    %c0_i32_0 = arith.constant 0 : i32
    return %arg0, %c0_i32 : i32, i32
  }
}

</mosaic_0001>

<bundles_post_ra>
// kernel: tpu_custom_call.1
= control target key start
LH: loop header
LB: loop body
LE: loop exit
PB: predicated region body
PF: predicated region fallthrough
CT: control target
= control target key end

     0   :  { %10 = vsyncpa [#allocation3], 0  ;;  %s1393_s0 = inlined_call_operand.hbm [shape: f32[2,1024], index: 0, kind: input, shape index: {}]   ;;  %s1394_s1 = inlined_call_operand.hbm [shape: bf16[128,1024], index: 1, kind: input, shape index: {}]   ;;  %s1395_s2 = inlined_call_operand.hbm [shape: bf16[128,128], index: 2, kind: input, shape index: {}]   ;;  %s1396_s3 = inlined_call_operand.hbm [shape: bf16[128,128], index: 3, kind: input, shape index: {}]   ;;  %s1397_s4 = inlined_call_operand.vmem [shape: f32[3,128], index: 4, kind: input, shape index: {}]   ;;  %s1398_s5 = inlined_call_operand.hbm [shape: f32[2,128], index: 5, kind: output, shape index: {}]  }
   0x1   :  { %11 = vsyncpa [#allocation6], 0 }
   0x2   :  { %12 = vsyncpa [#allocation9], 0 }
   0x3   :  { %13 = vsyncpa [#allocation4], 0  ;;  %s1234_s18 = smov [#allocation5]   ;;  %s1116_s22 = scalar_lea.hbm %s1394_s1, 8192 }
   0x4   :  { %s29_s19 = sshll.u32 %s1234_s18, 4  ;;  %p1117_p0 = scmp.ne.s32.totalorder %s1394_s1, %s1116_s22  ;;  %s30_s19 = int_to_ptr.vmem [resolvable:$true] %s29_s19 }
   0x5   :  { %p1120_p1 = scmp.lt.u32.totalorder %s1116_s22, %s1394_s1 }
   0x7   :  { %p1122_p2 = pnand %p1120_p1, %p1117_p0 }
   0x9   :  { %1125 = shalt.err (!%p1122_p2)
}
   0xa   :  { %s1126_s27 = scalar_lea.vmem %s30_s19, 8192  ;;  %p1131_p4 = scmp.lt.s32.totalorder %s30_s19, %s30_s19 }
   0xb   :  { %p1127_p3 = scmp.ne.s32.totalorder %s30_s19, %s1126_s27  ;;  %p1132_p5 = scmp.lt.s32.totalorder %s1126_s27, %s1126_s27 }
   0xd   :  { %p1133_p6 = por %p1132_p5, %p1131_p4 }
   0xf   :  { %p1134_p7 = pnand %p1133_p6, %p1127_p3 }
  0x11   :  { %1137 = shalt.err (!%p1134_p7)
}
  0x12   :  { %s1235_s28 = smov 512   ;;  %s1236_s29 = smov 32  }
  0x13   :  { %35 = dma.hbm_to_vmem [thread:$0]  %s1394_s1, 8192, %s30_s19, [#allocation6], %s1235_s28, %s1235_s28, %s1236_s29  }
  0x14   :  { %s1237_s7 = smov [#allocation2]   ;;  %s1238_s9 = smov [#allocation7]  }
  0x15   :  { %s20_s8 = sshll.u32 %s1237_s7, 4  ;;  %s41_s10 = sshll.u32 %s1238_s9, 4  ;;  %s21_s8 = int_to_ptr.vmem [resolvable:$true] %s20_s8  ;;  %s42_s10 = int_to_ptr.vmem [resolvable:$true] %s41_s10 }
  0x16   :  { %s1138_s13 = scalar_lea.hbm %s1393_s0, 256 }
  0x17   :  { %p1139_p8 = scmp.ne.s32.totalorder %s1393_s0, %s1138_s13  ;;  %p1142_p9 = scmp.lt.u32.totalorder %s1138_s13, %s1393_s0 }
  0x19   :  { %p1144_p10 = pnand %p1142_p9, %p1139_p8 }
  0x1b   :  { %1147 = shalt.err (!%p1144_p10)
}
  0x1c   :  { %s1148_s1 = scalar_lea.vmem %s21_s8, 256  ;;  %p1153_p12 = scmp.lt.s32.totalorder %s21_s8, %s21_s8 }
  0x1d   :  { %p1149_p11 = scmp.ne.s32.totalorder %s21_s8, %s1148_s1  ;;  %p1154_p13 = scmp.lt.s32.totalorder %s1148_s1, %s1148_s1 }
  0x1f   :  { %p1155_p0 = por %p1154_p13, %p1153_p12 }
  0x21   :  { %p1156_p1 = pnand %p1155_p0, %p1149_p11 }
  0x23   :  { %1159 = shalt.err (!%p1156_p1)
}
  0x24   :  { %23 = dma.hbm_to_vmem [thread:$0]  %s1393_s0, 256, %s21_s8, [#allocation3]  }
  0x25   :  { %s1160_s22 = scalar_lea.hbm %s1395_s2, 1024 }
  0x26   :  { %p1161_p2 = scmp.ne.s32.totalorder %s1395_s2, %s1160_s22  ;;  %p1164_p3 = scmp.lt.u32.totalorder %s1160_s22, %s1395_s2 }
  0x28   :  { %p1166_p4 = pnand %p1164_p3, %p1161_p2 }
  0x2a   :  { %1169 = shalt.err (!%p1166_p4)
}
  0x2b   :  { %s1170_s27 = scalar_lea.vmem %s42_s10, 1024  ;;  %p1175_p6 = scmp.lt.s32.totalorder %s42_s10, %s42_s10 }
  0x2c   :  { %p1171_p5 = scmp.ne.s32.totalorder %s42_s10, %s1170_s27  ;;  %p1176_p7 = scmp.lt.s32.totalorder %s1170_s27, %s1170_s27 }
  0x2e   :  { %p1177_p8 = por %p1176_p7, %p1175_p6 }
  0x30   :  { %p1178_p9 = pnand %p1177_p8, %p1171_p5 }
  0x32   :  { %1181 = shalt.err (!%p1178_p9)
}
  0x33   :  { %s1239_s0 = smov 64   ;;  %s1240_s28 = smov 4  }
  0x34   :  { %47 = dma.hbm_to_vmem [thread:$0]  %s1395_s2, 1024, %s42_s10, [#allocation6], %s1239_s0, %s1239_s0, %s1240_s28  }
  0x35   :  { %s1241_s6 = smov [#allocation8]   ;;  %s1182_s11 = scalar_lea.hbm %s1396_s3, 1024 }
  0x36   :  { %s53_s7 = sshll.u32 %s1241_s6, 4  ;;  %p1183_p10 = scmp.ne.s32.totalorder %s1396_s3, %s1182_s11  ;;  %s54_s7 = int_to_ptr.vmem [resolvable:$true] %s53_s7 }
  0x37   :  { %p1186_p11 = scmp.lt.u32.totalorder %s1182_s11, %s1396_s3 }
  0x39   :  { %p1188_p12 = pnand %p1186_p11, %p1183_p10 }
  0x3b   :  { %1191 = shalt.err (!%p1188_p12)
}
  0x3c   :  { %s1192_s16 = scalar_lea.vmem %s54_s7, 1024  ;;  %p1197_p0 = scmp.lt.s32.totalorder %s54_s7, %s54_s7 }
  0x3d   :  { %p1193_p13 = scmp.ne.s32.totalorder %s54_s7, %s1192_s16  ;;  %p1198_p1 = scmp.lt.s32.totalorder %s1192_s16, %s1192_s16 }
  0x3f   :  { %p1199_p2 = por %p1198_p1, %p1197_p0 }
  0x41   :  { %p1200_p3 = pnand %p1199_p2, %p1193_p13 }
  0x43   :  { %1203 = shalt.err (!%p1200_p3)
}
  0x44   :  { %59 = dma.hbm_to_vmem [thread:$0]  %s1396_s3, 1024, %s54_s7, [#allocation9], %s1239_s0, %s1239_s0, %s1240_s28  }
  0x45   :  { %1226 = dma.done.wait [#allocation3], 256  }
  0x46   :  { %1227 = vsyncadd [#allocation3], 4294967040 }
  0x47   :  { %1228 = dma.done.wait [#allocation6], 9216  }
  0x48   :  { %1229 = vsyncadd [#allocation6], 4294958080 }
  0x49   :  { %1230 = dma.done.wait [#allocation9], 1024  }
  0x4a   :  { %1231 = vsyncadd [#allocation9], 4294966272  ;;  %v1242_v0 = vmov 1983009808   ;;  %v83_v2 = vlaneseq  ;;  %v130_v3 = vld [vmem:[#allocation5 + $0x8] sm:$0xff]  ;;  %v1326_v13 = vld [vmem:[#allocation2] sm:$0xff] }
  0x4b   :  { %v81_v1 = vunpack.c.l.s4 %v1242_v0  ;;  %v134_v4 = vld [vmem:[#allocation5 + $0x28] sm:$0xff]  ;;  %v79_v16 = vcombine.high %v1326_v13, %v1326_v13  ;;  %v129_v21 = vld [vmem:[#allocation5] sm:$0xff]  ;;  %vm1244_vm0 = vmmov 0   ;;  %vm900_vm1 = vcmask 1041408   ;;  %s1245_s21 = smov [#allocation10]  }
  0x4c   :  { %v138_v5 = vld [vmem:[#allocation5 + $0x48] sm:$0xff]  ;;  %v84_v7 = vshrl.u32 %v83_v2, 7  ;;  %v935_v8 = vcombine.high %v130_v3, %v134_v4  ;;  %v934_v9 = vcombine.low %v130_v3, %v134_v4  ;;  %v133_v22 = vld [vmem:[#allocation5 + $0x20] sm:$0xff] }
  0x4d   :  { %v82_v6 = vunpack.c.0.s8 %v81_v1  ;;  %v142_v10 = vld [vmem:[#allocation5 + $0x68] sm:$0xff]  ;;  %v933_v24 = vcombine.high %v129_v21, %v133_v22  ;;  %v932_v25 = vcombine.low %v129_v21, %v133_v22  ;;  %v137_v26 = vld [vmem:[#allocation5 + $0x40] sm:$0xff]  ;;  %v143_v22 = vld [vmem:[#allocation5 + $0x70] sm:$0xff] }
  0x4e   :  { %v943_v11 = vcombine.high %v138_v5, %v142_v10  ;;  %558 = vmatprep.subr.bf16.mxu0 %v935_v8  ;;  %v146_v14 = vld [vmem:[#allocation5 + $0x88] sm:$0xff]  ;;  %v942_v17 = vcombine.low %v138_v5, %v142_v10  ;;  %v141_v27 = vld [vmem:[#allocation5 + $0x60] sm:$0xff]  ;;  %v1335_v5 = vld [vmem:[#allocation2 + $0x8] sm:$0xff] }
  0x4f   :  { %559 = vmatpush1.bf16.xpose.msra.mxu0 %v934_v9  ;;  %v1324_v12 = vsub.s32 %v82_v6, %v84_v7  ;;  %v150_v15 = vld [vmem:[#allocation5 + $0xa8] sm:$0xff]  ;;  %518 = vmatprep.subr.bf16.mxu1 %v933_v24  ;;  %v941_v30 = vcombine.high %v137_v26, %v141_v27  ;;  %v145_v31 = vld [vmem:[#allocation5 + $0x80] sm:$0xff]  ;;  %v940_v35 = vcombine.low %v137_v26, %v141_v27  ;;  %v131_v6 = vld [vmem:[#allocation5 + $0x10] sm:$0xff] }
  0x50   :  { %560 = vmatprep.subr.bf16.mxu0 %v943_v11  ;;  %v951_v19 = vcombine.high %v146_v14, %v150_v15  ;;  %v154_v28 = vld [vmem:[#allocation5 + $0xc8] sm:$0xff]  ;;  %519 = vmatpush1.bf16.xpose.msra.mxu1 %v932_v25  ;;  %v149_v32 = vld [vmem:[#allocation5 + $0xa0] sm:$0xff]  ;;  %v950_v33 = vcombine.low %v146_v14, %v150_v15  ;;  %v135_v7 = vld [vmem:[#allocation5 + $0x30] sm:$0xff] }
  0x51   :  { %v1331_v18 = vrot.slane %v79_v16, %v1324_v12  ;;  %v158_v29 = vld [vmem:[#allocation5 + $0xe8] sm:$0xff]  ;;  %520 = vmatprep.subr.bf16.mxu1 %v941_v30  ;;  %v949_v38 = vcombine.high %v145_v31, %v149_v32  ;;  %v153_v39 = vld [vmem:[#allocation5 + $0xc0] sm:$0xff]  ;;  %v948_v43 = vcombine.low %v145_v31, %v149_v32  ;;  %v86_v8 = vrot.slane %v1326_v13, %v1324_v12  ;;  %v139_v13 = vld [vmem:[#allocation5 + $0x50] sm:$0xff] }
  0x52   :  { %v959_v34 = vcombine.high %v154_v28, %v158_v29  ;;  %v162_v36 = vld [vmem:[#allocation5 + $0x108] sm:$0xff]  ;;  %v157_v40 = vld [vmem:[#allocation5 + $0xe0] sm:$0xff]  ;;  %v958_v41 = vcombine.low %v154_v28, %v158_v29  ;;  %v1341_v10 = vrot.slane %v1335_v5, %v1324_v12  ;;  %v937_v11 = vcombine.high %v131_v6, %v135_v7  ;;  %v147_v28 = vld [vmem:[#allocation5 + $0x90] sm:$0xff] }
  0x53   :  { %v95_v20 = vcombine.high %v1331_v18, %v1331_v18  ;;  %v166_v37 = vld [vmem:[#allocation5 + $0x128] sm:$0xff]  ;;  %v957_v44 = vcombine.high %v153_v39, %v157_v40  ;;  %v161_v49 = vld [vmem:[#allocation5 + $0x100] sm:$0xff]  ;;  %v956_v51 = vcombine.low %v153_v39, %v157_v40  ;;  %v94_v16 = vcombine.high %v86_v8, %v86_v8  ;;  %v151_v29 = vld [vmem:[#allocation5 + $0xb0] sm:$0xff] }
  0x54   :  { %v967_v42 = vcombine.high %v162_v36, %v166_v37  ;;  %v170_v45 = vld [vmem:[#allocation5 + $0x148] sm:$0xff]  ;;  %v966_v47 = vcombine.low %v162_v36, %v166_v37  ;;  %v165_v50 = vld [vmem:[#allocation5 + $0x120] sm:$0xff]  ;;  %v936_v24 = vcombine.low %v131_v6, %v135_v7  ;;  %v945_v26 = vcombine.high %v139_v13, %v143_v22  ;;  %v163_v39 = vld [vmem:[#allocation5 + $0x110] sm:$0xff] }
  0x55   :  { %v124_v23 = vpack.c.bf16 %v95_v20, %v95_v20  ;;  %v174_v46 = vld [vmem:[#allocation5 + $0x168] sm:$0xff]  ;;  %v965_v52 = vcombine.high %v161_v49, %v165_v50  ;;  %v169_v57 = vld [vmem:[#allocation5 + $0x140] sm:$0xff]  ;;  %v964_v59 = vcombine.low %v161_v49, %v165_v50  ;;  %v111_v20 = vcombine.high %v1341_v10, %v1341_v10  ;;  %v167_v40 = vld [vmem:[#allocation5 + $0x130] sm:$0xff] }
  0x56   :  { %v975_v48 = vcombine.high %v170_v45, %v174_v46  ;;  %v178_v53 = vld [vmem:[#allocation5 + $0x188] sm:$0xff]  ;;  %v974_v55 = vcombine.low %v170_v45, %v174_v46  ;;  %v173_v58 = vld [vmem:[#allocation5 + $0x160] sm:$0xff]  ;;  %v944_v30 = vcombine.low %v139_v13, %v143_v22  ;;  %v1243_v31 = vmov 0.0   ;;  %v175_v45 = vld [vmem:[#allocation5 + $0x170] sm:$0xff] }
  0x57   :  { %561 = vmatpush1.bf16.xpose.msra.mxu0 %v942_v17  ;;  %590 = vmatprep.mubr.bf16.mxu0 %v124_v23  ;;  %v182_v54 = vld [vmem:[#allocation5 + $0x1a8] sm:$0xff]  ;;  %v973_v60 = vcombine.high %v169_v57, %v173_v58  ;;  %v177_v1 = vld [vmem:[#allocation5 + $0x180] sm:$0xff]  ;;  %v972_v3 = vcombine.low %v169_v57, %v173_v58  ;;  %v123_v23 = vpack.c.bf16 %v1331_v18, %v1331_v18  ;;  %v179_v49 = vld [vmem:[#allocation5 + $0x190] sm:$0xff] }
  0x58   :  { %562 = vmatprep.subr.bf16.mxu0 %v951_v19  ;;  %521 = vmatpush1.bf16.xpose.msra.mxu1 %v940_v35  ;;  %v983_v56 = vcombine.high %v178_v53, %v182_v54  ;;  %v186_v61 = vld [vmem:[#allocation5 + $0x1c8] sm:$0xff]  ;;  %v982_v63 = vcombine.low %v178_v53, %v182_v54  ;;  %v181_v2 = vld [vmem:[#allocation5 + $0x1a0] sm:$0xff]  ;;  %v122_v19 = vpack.c.bf16 %v94_v16, %v94_v16  ;;  %v159_v35 = vld [vmem:[#allocation5 + $0xf0] sm:$0xff] }
  0x59   :  { %522 = vmatprep.subr.bf16.mxu1 %v949_v38  ;;  %v190_v62 = vld [vmem:[#allocation5 + $0x1e8] sm:$0xff]  ;;  %v981_v4 = vcombine.high %v177_v1, %v181_v2  ;;  %v185_v14 = vld [vmem:[#allocation5 + $0x1c0] sm:$0xff]  ;;  %v980_v17 = vcombine.low %v177_v1, %v181_v2  ;;  %v126_v25 = vpack.c.bf16 %v111_v20, %v111_v20  ;;  %v953_v32 = vcombine.high %v147_v28, %v151_v29  ;;  %v183_v50 = vld [vmem:[#allocation5 + $0x1b0] sm:$0xff] }
  0x5a   :  { %v991_v0 = vcombine.high %v186_v61, %v190_v62  ;;  %v990_v9 = vcombine.low %v186_v61, %v190_v62  ;;  %v189_v15 = vld [vmem:[#allocation5 + $0x1e0] sm:$0xff]  ;;  %550 = vmatprep.mubr.bf16.mxu1 %v122_v19  ;;  %v952_v36 = vcombine.low %v147_v28, %v151_v29  ;;  %v1097_v38 = vld [vmem:[#allocation7 + $0x8] sm:$0xff]   ;;  %v968_v46 = vcombine.low %v163_v39, %v167_v40  ;;  %v187_v54 = vld [vmem:[#allocation5 + $0x1d0] sm:$0xff] }
  0x5b   :  { %v989_v21 = vcombine.high %v185_v14, %v189_v15  ;;  %v988_v27 = vcombine.low %v185_v14, %v189_v15  ;;  %v1096_v18 = vld [vmem:[#allocation7] sm:$0xff]   ;;  %v1101_v58 = vld [vmem:[#allocation7 + $0x28] sm:$0xff]   ;;  %v136_v61 = vld [vmem:[#allocation5 + $0x38] sm:$0xff]  ;;  %v125_v6 = vpack.c.bf16 %v1341_v10, %v1341_v10 }
  0x5c   :  { %v1100_v53 = vld [vmem:[#allocation7 + $0x20] sm:$0xff]   ;;  %v1102_v1 = vld [vmem:[#allocation7 + $0x30] sm:$0xff]   ;;  %v156_v15 = vld [vmem:[#allocation5 + $0xd8] sm:$0xff] }
  0x5d   :  { %v160_v16 = vld [vmem:[#allocation5 + $0xf8] sm:$0xff] }
  0x5e   :  { %v963_v10 = vcombine.high %v156_v15, %v160_v16  ;;  %v164_v19 = vld [vmem:[#allocation5 + $0x118] sm:$0xff] }
  0x5f   :  { %563 = vmatpush1.bf16.xpose.msra.mxu0 %v950_v33  ;;  %v121_v33 = vpack.c.bf16 %v86_v8, %v86_v8  ;;  %v168_v20 = vld [vmem:[#allocation5 + $0x138] sm:$0xff] }
  0x60   :  { %564 = vmatprep.subr.bf16.mxu0 %v959_v34  ;;  %523 = vmatpush1.bf16.xpose.msra.mxu1 %v948_v43  ;;  %v155_v34 = vld [vmem:[#allocation5 + $0xd0] sm:$0xff]  ;;  %v971_v13 = vcombine.high %v164_v19, %v168_v20  ;;  %v172_v22 = vld [vmem:[#allocation5 + $0x158] sm:$0xff] }
  0x61   :  { %524 = vmatprep.subr.bf16.mxu1 %v957_v44  ;;  %v961_v37 = vcombine.high %v155_v34, %v159_v35  ;;  %v1098_v43 = vld [vmem:[#allocation7 + $0x10] sm:$0xff]  }
  0x62   :  { %v171_v44 = vld [vmem:[#allocation5 + $0x150] sm:$0xff] }
  0x67   :  { %565 = vmatpush1.bf16.xpose.msra.mxu0 %v958_v41  ;;  %v960_v41 = vcombine.low %v155_v34, %v159_v35 }
  0x68   :  { %566 = vmatprep.subr.bf16.mxu0 %v967_v42  ;;  %525 = vmatpush1.bf16.xpose.msra.mxu1 %v956_v51  ;;  %v969_v42 = vcombine.high %v163_v39, %v167_v40  ;;  %v976_v51 = vcombine.low %v171_v44, %v175_v45 }
  0x69   :  { %526 = vmatprep.subr.bf16.mxu1 %v965_v52  ;;  %v985_v52 = vcombine.high %v179_v49, %v183_v50 }
  0x6f   :  { %567 = vmatpush1.bf16.xpose.msra.mxu0 %v966_v47  ;;  %v977_v47 = vcombine.high %v171_v44, %v175_v45 }
  0x70   :  { %568 = vmatprep.subr.bf16.mxu0 %v975_v48  ;;  %527 = vmatpush1.bf16.xpose.msra.mxu1 %v964_v59  ;;  %v1099_v48 = vld [vmem:[#allocation7 + $0x18] sm:$0xff]   ;;  %v96_v59 = vcombine.high %v1335_v5, %v1335_v5 }
  0x71   :  { %528 = vmatprep.subr.bf16.mxu1 %v973_v60  ;;  %v132_v60 = vld [vmem:[#allocation5 + $0x18] sm:$0xff] }
  0x72   :  { %v938_v5 = vcombine.low %v132_v60, %v136_v61 }
  0x77   :  { %569 = vmatpush1.bf16.xpose.msra.mxu0 %v974_v55  ;;  %v191_v55 = vld [vmem:[#allocation5 + $0x1f0] sm:$0xff] }
  0x78   :  { %570 = vmatprep.subr.bf16.mxu0 %v983_v56  ;;  %529 = vmatpush1.bf16.xpose.msra.mxu1 %v972_v3  ;;  %v984_v56 = vcombine.low %v179_v49, %v183_v50  ;;  %v993_v57 = vcombine.high %v187_v54, %v191_v55  ;;  %v992_v62 = vcombine.low %v187_v54, %v191_v55  ;;  %v140_v3 = vld [vmem:[#allocation5 + $0x58] sm:$0xff]  ;;  %v1104_v49 = vld [vmem:[#allocation8] sm:$0xff]   ;;  %v1109_v55 = vld [vmem:[#allocation8 + $0x28] sm:$0xff]  }
  0x79   :  { %530 = vmatprep.subr.bf16.mxu1 %v981_v4  ;;  %v144_v4 = vld [vmem:[#allocation5 + $0x78] sm:$0xff]  ;;  %v1108_v54 = vld [vmem:[#allocation8 + $0x20] sm:$0xff]  }
  0x7a   :  { %v947_v8 = vcombine.high %v140_v3, %v144_v4 }
  0x7f   :  { %571 = vmatpush1.bf16.xpose.msra.mxu0 %v982_v63  ;;  %v110_v63 = vrot.slane %v96_v59, %v1324_v12  ;;  %v148_v12 = vld [vmem:[#allocation5 + $0x98] sm:$0xff] }
  0x80   :  { %572 = vmatprep.subr.bf16.mxu0 %v991_v0  ;;  %531 = vmatpush1.bf16.xpose.msra.mxu1 %v980_v17  ;;  %v939_v0 = vcombine.high %v132_v60, %v136_v61 }
  0x81   :  { %532 = vmatprep.subr.bf16.mxu1 %v989_v21  ;;  %v112_v2 = vcombine.high %v110_v63, %v110_v63  ;;  %v962_v21 = vcombine.low %v156_v15, %v160_v16  ;;  %v127_v35 = vpack.c.bf16 %v110_v63, %v110_v63 }
  0x83   :  { %v128_v7 = vpack.c.bf16 %v112_v2, %v112_v2  ;;  %v1005_v2 = vld [vmem:[%s1397_s4 + $0x2] ss:$0 sm:$0xff] }
  0x87   :  { %573 = vmatpush1.bf16.xpose.msra.mxu0 %v990_v9  ;;  %v152_v9 = vld [vmem:[#allocation5 + $0xb8] sm:$0xff] }
  0x88   :  { %598 = vmatprep.subr.bf16.mxu0 %v937_v11  ;;  %533 = vmatpush1.bf16.xpose.msra.mxu1 %v988_v27  ;;  %v946_v11 = vcombine.low %v140_v3, %v144_v4  ;;  %v955_v14 = vcombine.high %v148_v12, %v152_v9  ;;  %v954_v17 = vcombine.low %v148_v12, %v152_v9  ;;  %v184_v27 = vld [vmem:[#allocation5 + $0x1b8] sm:$0xff] }
  0x89   :  { %1032 = vmatprep.subr.bf16.mxu1 %v1243_v31 }
  0x8e   :  { %591 = vmatmul.mubr.bf16.vlgmr.msra.gmra.mrb[0].mxu0 %v123_v23  ;;  %v176_v23 = vld [vmem:[#allocation5 + $0x178] sm:$0xff] }
  0x8f   :  { %599 = vmatpush1.bf16.xpose.msra.mxu0 %v936_v24  ;;  %630 = vmatprep.mubr.bf16.mxu0 %v126_v25  ;;  %v970_v24 = vcombine.low %v164_v19, %v168_v20  ;;  %v979_v25 = vcombine.high %v172_v22, %v176_v23  ;;  %v978_v28 = vcombine.low %v172_v22, %v176_v23 }
  0x90   :  { %600 = vmatprep.subr.bf16.mxu0 %v945_v26  ;;  %551 = vmatmul.mubr.bf16.vlgmr.msra.gmra.mrb[0].mxu1 %v121_v33  ;;  %v180_v26 = vld [vmem:[#allocation5 + $0x198] sm:$0xff] }
  0x91   :  { %1033 = vmatpush3.bf16.xpose.msra.mxu1 %v1096_v18  ;;  %v987_v29 = vcombine.high %v180_v26, %v184_v27  ;;  %v986_v33 = vcombine.low %v180_v26, %v184_v27  ;;  %1048 = vmatprep.mubr.msk.bf16.mxu1 %vm1244_vm0, %v1243_v31 }
  0x92   :  { %1034 = vmatprep.subr.bf16.mxu1 %v1243_v31 }
  0x97   :  { %601 = vmatpush1.bf16.xpose.msra.mxu0 %v944_v30  ;;  %v188_v30 = vld [vmem:[#allocation5 + $0x1d8] sm:$0xff] }
  0x98   :  { %602 = vmatprep.subr.bf16.mxu0 %v953_v32  ;;  %v192_v32 = vld [vmem:[#allocation5 + $0x1f8] sm:$0xff] }
  0x99   :  { %1035 = vmatpush3.bf16.xpose.msra.mxu1 %v1097_v38  ;;  %v995_v18 = vcombine.high %v188_v30, %v192_v32  ;;  %v994_v34 = vcombine.low %v188_v30, %v192_v32 }
  0x9a   :  { %1036 = vmatprep.subr.bf16.mxu1 %v1243_v31 }
  0x9f   :  { %603 = vmatpush1.bf16.xpose.msra.mxu0 %v952_v36  ;;  %v1103_v36 = vld [vmem:[#allocation7 + $0x38] sm:$0xff]  }
  0xa0   :  { %604 = vmatprep.subr.bf16.mxu0 %v961_v37 }
  0xa1   :  { %1037 = vmatpush3.bf16.xpose.msra.mxu1 %v1098_v43 }
  0xa2   :  { %1038 = vmatprep.subr.bf16.mxu1 %v1243_v31 }
  0xa7   :  { %605 = vmatpush1.bf16.xpose.msra.mxu0 %v960_v41  ;;  %v931_v41 = vld [vmem:[%s1397_s4] ss:$0 sm:$0xff] }
  0xa8   :  { %606 = vmatprep.subr.bf16.mxu0 %v969_v42 }
  0xa9   :  { %1039 = vmatpush3.bf16.xpose.msra.mxu1 %v1099_v48 }
  0xaa   :  { %1040 = vmatprep.subr.bf16.mxu1 %v1243_v31 }
  0xaf   :  { %607 = vmatpush1.bf16.xpose.msra.mxu0 %v968_v46 }
  0xb0   :  { %608 = vmatprep.subr.bf16.mxu0 %v977_v47 }
  0xb1   :  { %1041 = vmatpush3.bf16.xpose.msra.mxu1 %v1100_v53  ;;  %v1107_v53 = vld [vmem:[#allocation8 + $0x18] sm:$0xff]  }
  0xb2   :  { %1042 = vmatprep.subr.bf16.mxu1 %v1243_v31 }
  0xb7   :  { %609 = vmatpush1.bf16.xpose.msra.mxu0 %v976_v51  ;;  %v1105_v51 = vld [vmem:[#allocation8 + $0x8] sm:$0xff]  }
  0xb8   :  { %610 = vmatprep.subr.bf16.mxu0 %v985_v52  ;;  %v1106_v52 = vld [vmem:[#allocation8 + $0x10] sm:$0xff]  }
  0xb9   :  { %1043 = vmatpush3.bf16.xpose.msra.mxu1 %v1101_v58  ;;  %v996_v58 = vld [vmem:[%s1397_s4 + $0x1] ss:$0 sm:$0xff]  ;;  %s920_s4 = sshll.u32 %s1245_s21, 4  ;;  %s921_s4 = int_to_ptr.vmem [resolvable:$true] %s920_s4 }
  0xba   :  { %1044 = vmatprep.subr.bf16.mxu1 %v1243_v31  ;;  %s1204_s22 = scalar_lea.vmem %s921_s4, 32  ;;  %p1209_p5 = scmp.lt.s32.totalorder %s921_s4, %s921_s4 }
  0xbb   :  { %p1205_p4 = scmp.ne.s32.totalorder %s921_s4, %s1204_s22  ;;  %p1210_p6 = scmp.lt.s32.totalorder %s1204_s22, %s1204_s22 }
  0xbd   :  { %p1211_p7 = por %p1210_p6, %p1209_p5 }
  0xbf   :  { %611 = vmatpush1.bf16.xpose.msra.mxu0 %v984_v56  ;;  %v1110_v56 = vld [vmem:[#allocation8 + $0x30] sm:$0xff]   ;;  %p1212_p8 = pnand %p1211_p7, %p1205_p4 }
  0xc0   :  { %612 = vmatprep.subr.bf16.mxu0 %v993_v57  ;;  %v1111_v57 = vld [vmem:[#allocation8 + $0x38] sm:$0xff]  }
  0xc1   :  { %1045 = vmatpush3.bf16.xpose.msra.mxu1 %v1102_v1 }
  0xc2   :  { %1046 = vmatprep.subr.bf16.mxu1 %v1243_v31 }
  0xc7   :  { %613 = vmatpush1.bf16.xpose.msra.mxu0 %v992_v62 }
  0xc8   :  { %638 = vmatprep.subr.bf16.mxu0 %v939_v0 }
  0xc9   :  { %1047 = vmatpush3.bf16.xpose.msra.mxu1 %v1103_v36 }
  0xca   :  { %1052 = vmatprep.subr.bf16.mxu1 %v1243_v31 }
  0xce   :  { %631 = vmatmul.mubr.bf16.vlgmr.msra.gmra.mrb[0].mxu0 %v125_v6 }
  0xcf   :  { %639 = vmatpush1.bf16.xpose.msra.mxu0 %v938_v5  ;;  %670 = vmatprep.mubr.bf16.mxu0 %v128_v7 }
  0xd0   :  { %640 = vmatprep.subr.bf16.mxu0 %v947_v8 }
  0xd7   :  { %641 = vmatpush1.bf16.xpose.msra.mxu0 %v946_v11 }
  0xd8   :  { %642 = vmatprep.subr.bf16.mxu0 %v955_v14 }
  0xdf   :  { %643 = vmatpush1.bf16.xpose.msra.mxu0 %v954_v17 }
  0xe0   :  { %644 = vmatprep.subr.bf16.mxu0 %v963_v10 }
  0xe7   :  { %645 = vmatpush1.bf16.xpose.msra.mxu0 %v962_v21 }
  0xe8   :  { %646 = vmatprep.subr.bf16.mxu0 %v971_v13 }
  0xef   :  { %647 = vmatpush1.bf16.xpose.msra.mxu0 %v970_v24 }
  0xf0   :  { %648 = vmatprep.subr.bf16.mxu0 %v979_v25 }
  0xf7   :  { %649 = vmatpush1.bf16.xpose.msra.mxu0 %v978_v28 }
  0xf8   :  { %650 = vmatprep.subr.bf16.mxu0 %v987_v29 }
  0xff   :  { %651 = vmatpush1.bf16.xpose.msra.mxu0 %v986_v33 }
 0x100   :  { %652 = vmatprep.subr.bf16.mxu0 %v995_v18 }
 0x107   :  { %653 = vmatpush1.bf16.xpose.msra.mxu0 %v994_v34 }
 0x10e   :  { %671 = vmatmul.mubr.bf16.vlgmr.msra.gmra.mrb[0].mxu0 %v127_v35 }
 0x163   :  { %v552_v37 = vpop.f32.mrb[0].mxu1 }
 0x164   :  { %v554_v38 = vpop.f32.mrb[1].mxu1  ;;  %v553_v42 = vadd.f32 %v931_v41, %v552_v37 }
 0x165   :  { %v555_v39 = vpop.f32.mrb[2].mxu1 }
 0x166   :  { %v556_v40 = vpop.f32.mrb[3].mxu1 }
 0x1e1   :  { %v672_v43 = vpop.f32.mrb[0].mxu0 }
 0x1e2   :  { %v1073_v44 = vadd.f32 %v672_v43, %v553_v42  ;;  %v674_v45 = vpop.f32.mrb[1].mxu0 }
 0x1e3   :  { %v675_v46 = vpop.f32.mrb[2].mxu0 }
 0x1e4   :  { %v678_v47 = vmax.f32 %v1073_v44, 0.0  ;;  %v676_v48 = vpop.f32.mrb[3].mxu0 }
 0x1e6   :  { %v679_v50 = vpack.c.bf16 %v678_v47, %v678_v47 }
 0x1e8   :  { %1049 = vmatmul.mubr.bf16.vlgmr.msra.gmra.mrb[4].mxu1 %v679_v50 }
 0x1e9   :  { %1053 = vmatpush3.bf16.xpose.msra.mxu1 %v1104_v49  ;;  %1068 = vmatprep.mubr.msk.bf16.mxu1 %vm1244_vm0, %v1243_v31 }
 0x1ea   :  { %1054 = vmatprep.subr.bf16.mxu1 %v1243_v31 }
 0x1f1   :  { %1055 = vmatpush3.bf16.xpose.msra.mxu1 %v1105_v51 }
 0x1f2   :  { %1056 = vmatprep.subr.bf16.mxu1 %v1243_v31 }
 0x1f9   :  { %1057 = vmatpush3.bf16.xpose.msra.mxu1 %v1106_v52 }
 0x1fa   :  { %1058 = vmatprep.subr.bf16.mxu1 %v1243_v31 }
 0x201   :  { %1059 = vmatpush3.bf16.xpose.msra.mxu1 %v1107_v53 }
 0x202   :  { %1060 = vmatprep.subr.bf16.mxu1 %v1243_v31 }
 0x209   :  { %1061 = vmatpush3.bf16.xpose.msra.mxu1 %v1108_v54 }
 0x20a   :  { %1062 = vmatprep.subr.bf16.mxu1 %v1243_v31 }
 0x211   :  { %1063 = vmatpush3.bf16.xpose.msra.mxu1 %v1109_v55 }
 0x212   :  { %1064 = vmatprep.subr.bf16.mxu1 %v1243_v31 }
 0x219   :  { %1065 = vmatpush3.bf16.xpose.msra.mxu1 %v1110_v56 }
 0x21a   :  { %1066 = vmatprep.subr.bf16.mxu1 %v1243_v31 }
 0x221   :  { %1067 = vmatpush3.bf16.xpose.msra.mxu1 %v1111_v57 }
 0x2bb   :  { %v783_v59 = vpop.f32.mrb[4].mxu1 }
 0x2bc   :  { %v784_v60 = vadd.f32 %v996_v58, %v783_v59  ;;  %v1050_v61 = vpop.f32.mrb[5].mxu1 }
 0x2bd   :  { %v786_v62 = vpop.f32.mrb[6].mxu1 }
 0x2be   :  { %v789_v63 = vmax.f32 %v784_v60, 0.0  ;;  %v1051_v0 = vpop.f32.mrb[7].mxu1 }
 0x2c0   :  { %v790_v1 = vpack.c.bf16 %v789_v63, %v789_v63 }
 0x2c2   :  { %1069 = vmatmul.mubr.bf16.vlgmr.msra.gmra.mrb[8].mxu1 %v790_v1 }
 0x395   :  { %v894_v3 = vpop.f32.mrb[8].mxu1 }
 0x396   :  { %v895_v31 = vadd.f32 %v1005_v2, %v894_v3  ;;  %v1070_v4 = vpop.f32.mrb[9].mxu1 }
 0x397   :  { %v897_v6 = vpop.f32.mrb[10].mxu1 }
 0x398   :  { %v1071_v5 = vpop.f32.mrb[11].mxu1  ;;  %v901_v7 = vsel %vm900_vm1, %v895_v31, -inf }
 0x399   :  { %902 = vmax.xlane.f32.xlu0 %v901_v7 }
 0x426   :  { %v903_v8 = vpop.xlane.xlu0 %902 }
 0x427   :  { %v904_v12 = vsub.f32 %v895_v31, %v903_v8 }
 0x429   :  { %v905_v9 = vmul.f32 1.442695, %v904_v12 }
 0x42b   :  { %1112 = vpow2.f32 %v905_v9 }
 0x435   :  { %v1113_v11 = vpop.eup %1112 }
 0x436   :  { %v907_v14 = vsel %vm900_vm1, %v1113_v11, 0.0 }
 0x437   :  { %908 = vadd.xlane.f32.xlu0 %v907_v14 }
 0x4c4   :  { %v909_v15 = vpop.xlane.xlu0 %908 }
 0x4c5   :  { %1114 = vlog2.f32 %v909_v15 }
 0x4cf   :  { %v1115_v16 = vpop.eup %1114 }
 0x4d0   :  { %v911_v17 = vmul.f32 0.6931472, %v1115_v16 }
 0x4d2   :  { %v912_v10 = vsub.f32 %v904_v12, %v911_v17 }
 0x4d4   :  { %913 = vst [vmem:[#allocation10] sm:$0x3] %v912_v10 }
 0x4d5   :  { %1215 = shalt.err (!%p1212_p8)
}
 0x4d6   :  { %s1216_s25 = scalar_lea.hbm %s1398_s5, 32 }
 0x4d7   :  { %p1217_p9 = scmp.ne.s32.totalorder %s1398_s5, %s1216_s25  ;;  %p1220_p10 = scmp.lt.u32.totalorder %s1216_s25, %s1398_s5 }
 0x4d9   :  { %p1222_p11 = pnand %p1220_p10, %p1217_p9 }
 0x4db   :  { %1225 = shalt.err (!%p1222_p11)
}
 0x4dc   :  { %923 = dma.vmem_to_hbm [thread:$0]  %s921_s4, 32, %s1398_s5, [#allocation4]  }
 0x4dd   :  { %1232 = dma.done.wait [#allocation4], 32  }
 0x4de   :  { %1233 = vsyncadd [#allocation4], 4294967264 }
 0x4df   :  { %927 = vsyncpa [#allocation3], 1 }
 0x4e0   :  { %928 = vsyncpa [#allocation6], 1 }
 0x4e1   :  { %929 = vsyncpa [#allocation9], 1 }
 0x4e2   :  { %930 = vsyncpa [#allocation4], 1 }

</bundles_post_ra>
